<compile_context>
chip_gen: v6e
topology: v6e:2x2x1
jax: 0.10.0
libtpu: 0.0.40
codegen_flags: <defaults>
</compile_context>

<pallas_src>
import functools
import math

import jax
import jax.numpy as jnp
from jax import lax
from jax.experimental import pallas as pl
from jax.experimental.pallas import tpu as pltpu


# ---------------------------------------------------------------------------
# Fused kernel: one batch element per grid step.
# ---------------------------------------------------------------------------
def _fused_attention_kernel(x_ref, wqkv_ref, wout_ref, bout_ref, o_ref, *,
                            heads, scale, mxu_dtype):
    # x_ref    : [1, n, dim]     (one batch element)
    # wqkv_ref : [dim, 3*inner]  resident
    # wout_ref : [inner, dim]    resident
    # bout_ref : [1, dim]        resident
    # o_ref    : [1, n, dim]
    x = x_ref[0]                                             # [n, dim]
    inner = wout_ref.shape[0]
    d = inner // heads
    cdt = x.dtype if mxu_dtype is None else mxu_dtype        # MXU operand dtype

    # ---- 1) QKV projection on the MXU, f32 accumulation --------------------
    qkv = jnp.dot(x.astype(cdt), wqkv_ref[...].astype(cdt),
                  preferred_element_type=jnp.float32)        # [n, 3*inner] f32

    # Lane-block-aligned column splits (inner = heads*d = 128 -> 128-lane slices).
    # Fold the softmax scale into q: n*inner elements instead of heads*n*n scores.
    q_all = qkv[:, :inner] * scale                           # [n, inner] f32
    k_all = qkv[:, inner:2 * inner]                          # [n, inner] f32
    v_all = qkv[:, 2 * inner:]                               # [n, inner] f32

    # ---- 2) Per-head attention (static, fully unrolled head loop) ----------
    outs = []
    for h in range(heads):
        lo, hi = h * d, (h + 1) * d
        q_h = q_all[:, lo:hi].astype(cdt)                    # [n, d]
        k_h = k_all[:, lo:hi].astype(cdt)                    # [n, d]
        v_h = v_all[:, lo:hi].astype(cdt)                    # [n, d]

        # dots = q_h @ k_h^T (contract on d), f32 accumulate on the MXU.
        dots = lax.dot_general(q_h, k_h, (((1,), (1,)), ((), ())),
                               preferred_element_type=jnp.float32)   # [n, n]

        # Numerically stable softmax; epilogue stays f32 (v5e: no bf16 VPU/EUP).
        m = jnp.max(dots, axis=-1, keepdims=True)
        p = jnp.exp(dots - m)
        denom = jnp.sum(p, axis=-1, keepdims=True)
        attn = p * pl.reciprocal(denom, approx=True)         # divide -> EUP slot

        # out_h = attn @ v_h, probabilities cast back to the MXU dtype.
        outs.append(jnp.dot(attn.astype(cdt), v_h,
                            preferred_element_type=jnp.float32))     # [n, d]

    # 'h n d -> n (h d)': lane-concatenate back to a 128-lane dense tile.
    attn_out = jnp.concatenate(outs, axis=-1)                # [n, inner] f32

    # ---- 3) Output projection + bias (Dropout is identity at inference) ----
    y = jnp.dot(attn_out.astype(cdt), wout_ref[...].astype(cdt),
                preferred_element_type=jnp.float32)          # [n, dim] f32
    y = y + bout_ref[...].astype(jnp.float32)                # bias add in f32
    o_ref[0] = y.astype(o_ref.dtype)


# ---------------------------------------------------------------------------
# Wrapper
# ---------------------------------------------------------------------------
def attention_forward(x, w_qkv, w_out, b_out, *, heads, mxu_dtype=None):
    """x: [b, n, dim]; w_qkv: [dim, 3*inner]; w_out: [inner, dim]; b_out: [dim]."""
    b, n, dim = x.shape
    inner = w_out.shape[0]
    assert w_qkv.shape == (dim, 3 * inner)
    assert inner % heads == 0
    scale = dim ** (-0.5)                # NOTE: module scales by dim, not dim_head

    kernel = functools.partial(_fused_attention_kernel, heads=heads, scale=scale,
                               mxu_dtype=mxu_dtype)

    return pl.pallas_call(
        kernel,
        out_shape=jax.ShapeDtypeStruct((b, n, dim), x.dtype),
        grid_spec=pltpu.PrefetchScalarGridSpec(
            num_scalar_prefetch=0,
            grid=(b,),
            in_specs=[
                pl.BlockSpec((1, n, dim), lambda i: (i, 0, 0)),     # x (pipelined)
                pl.BlockSpec((dim, 3 * inner), lambda i: (0, 0)),   # w_qkv, resident
                pl.BlockSpec((inner, dim), lambda i: (0, 0)),       # w_out, resident
                pl.BlockSpec((1, dim), lambda i: (0, 0)),           # b_out, resident
            ],
            out_specs=pl.BlockSpec((1, n, dim), lambda i: (i, 0, 0)),
        ),
        compiler_params=pltpu.CompilerParams(
            dimension_semantics=("parallel",),       # independent batch blocks
            vmem_limit_bytes=32 * 1024 * 1024,       # explicit, safe on v5e/v6e/v7x
        ),
    )(x, w_qkv, w_out, b_out.reshape(1, dim))


# ---------------------------------------------------------------------------
# Pure-JAX reference (matches the PyTorch forward, mask=None, eval mode)
# ---------------------------------------------------------------------------
def _ref_attention(x, w_qkv, w_out, b_out, *, heads):
    b, n, dim = x.shape
    inner = w_qkv.shape[1] // 3
    d = inner // heads
    scale = dim ** (-0.5)
    hi = lax.Precision.HIGHEST

    qkv = jnp.einsum('bnk,km->bnm', x, w_qkv, precision=hi)
    q, k, v = jnp.split(qkv, 3, axis=-1)
    split = lambda t: t.reshape(b, n, heads, d).transpose(0, 2, 1, 3)
    q, k, v = split(q), split(k), split(v)

    dots = jnp.einsum('bhid,bhjd->bhij', q, k, precision=hi) * scale
    attn = jax.nn.softmax(dots, axis=-1)
    out = jnp.einsum('bhij,bhjd->bhid', attn, v, precision=hi)
    out = out.transpose(0, 2, 1, 3).reshape(b, n, inner)
    return jnp.einsum('bnk,km->bnm', out, w_out, precision=hi) + b_out


if __name__ == "__main__":
    key = jax.random.PRNGKey(0)
    batch, seq, dim = 2, 8, 32
    heads, dim_head = 4, 32
    inner = heads * dim_head                     # 128 (lane-dense)

    k_x, k_qkv, k_ow, k_ob = jax.random.split(key, 4)

    # PyTorch nn.Linear-like uniform init; weights stored pre-transposed [in, out].
    bound_qkv = 1.0 / math.sqrt(dim)
    bound_out = 1.0 / math.sqrt(inner)
    w_qkv = jax.random.uniform(k_qkv, (dim, 3 * inner), jnp.float32,
                               -bound_qkv, bound_qkv)
    w_out = jax.random.uniform(k_ow, (inner, dim), jnp.float32,
                               -bound_out, bound_out)
    b_out = jax.random.uniform(k_ob, (dim,), jnp.float32,
                               -bound_out, bound_out)

    x = jax.random.normal(k_x, (batch, seq, dim), jnp.float32)

    y = attention_forward(x, w_qkv, w_out, b_out, heads=heads)
    y = jax.block_until_ready(y)

    y_ref = _ref_attention(x, w_qkv, w_out, b_out, heads=heads)
    assert y.shape == (batch, seq, dim)
    max_err = float(jnp.max(jnp.abs(y - y_ref)))
    # Small headroom over the previous 1e-3 for the EUP approximate reciprocal.
    assert jnp.allclose(y, y_ref, atol=2e-3, rtol=2e-3), max_err

    print("KERNEL_OK")
</pallas_src>

<mosaic_0001>
module attributes {stable_mosaic.version = 11 : i64} {
  func.func @_fused_attention_kernel(%arg0: i32, %arg1: memref<1x8x32xf32, #tpu.memory_space<vmem>>, %arg2: memref<32x384xf32, #tpu.memory_space<vmem>>, %arg3: memref<128x32xf32, #tpu.memory_space<vmem>>, %arg4: memref<1x32xf32, #tpu.memory_space<vmem>>, %arg5: memref<1x8x32xf32, #tpu.memory_space<vmem>>) attributes {dimension_semantics = [#tpu.dimension_semantics<parallel>], iteration_bounds = array<i64: 2>, scalar_prefetch = 0 : i64, scratch_operands = 0 : i64, tpu.core_type = #tpu.core_type<tc>, window_params = [{transform_indices = @transform_0, window_bounds = array<i64: 1, 8, 32>}, {pipeline_mode = #tpu.pipeline_mode<synchronous>, transform_indices = @transform_1, window_bounds = array<i64: 32, 384>}, {pipeline_mode = #tpu.pipeline_mode<synchronous>, transform_indices = @transform_2, window_bounds = array<i64: 128, 32>}, {pipeline_mode = #tpu.pipeline_mode<synchronous>, transform_indices = @transform_3, window_bounds = array<i64: 1, 32>}, {transform_indices = @transform_4, window_bounds = array<i64: 1, 8, 32>}]} {
    %c0 = arith.constant 0 : index
    %c0_0 = arith.constant 0 : index
    %c0_1 = arith.constant 0 : index
    %0 = vector.load %arg1[%c0, %c0_0, %c0_1] : memref<1x8x32xf32, #tpu.memory_space<vmem>>, vector<1x8x32xf32>
    %1 = vector.shape_cast %0 : vector<1x8x32xf32> to vector<8x32xf32>
    %c0_2 = arith.constant 0 : index
    %c0_3 = arith.constant 0 : index
    %2 = vector.load %arg2[%c0_2, %c0_3] : memref<32x384xf32, #tpu.memory_space<vmem>>, vector<32x384xf32>
    %cst = arith.constant dense<0.000000e+00> : vector<8x384xf32>
    %3 = tpu.matmul %1, %2, %cst {dimension_numbers = #tpu.dot_dimension_numbers<[1], [0], [0], [1], [0, 0, 1, 1], [], []>} : vector<8x32xf32>, vector<32x384xf32>, vector<8x384xf32> -> vector<8x384xf32>
    %4 = vector.extract_strided_slice %3 {offsets = [0, 0], sizes = [8, 128], strides = [1, 1]} : vector<8x384xf32> to vector<8x128xf32>
    %cst_4 = arith.constant 0.176776692 : f32
    %5 = vector.broadcast %cst_4 : f32 to vector<8x128xf32>
    %6 = arith.mulf %4, %5 : vector<8x128xf32>
    %7 = vector.extract_strided_slice %3 {offsets = [0, 128], sizes = [8, 128], strides = [1, 1]} : vector<8x384xf32> to vector<8x128xf32>
    %8 = vector.extract_strided_slice %3 {offsets = [0, 256], sizes = [8, 128], strides = [1, 1]} : vector<8x384xf32> to vector<8x128xf32>
    %9 = vector.extract_strided_slice %6 {offsets = [0, 0], sizes = [8, 32], strides = [1, 1]} : vector<8x128xf32> to vector<8x32xf32>
    %10 = vector.extract_strided_slice %7 {offsets = [0, 0], sizes = [8, 32], strides = [1, 1]} : vector<8x128xf32> to vector<8x32xf32>
    %11 = vector.extract_strided_slice %8 {offsets = [0, 0], sizes = [8, 32], strides = [1, 1]} : vector<8x128xf32> to vector<8x32xf32>
    %cst_5 = arith.constant dense<0.000000e+00> : vector<8x8xf32>
    %12 = tpu.matmul %9, %10, %cst_5 {dimension_numbers = #tpu.dot_dimension_numbers<[1], [1], [0], [0], [0, 0, 1, 0], [], []>} : vector<8x32xf32>, vector<8x32xf32>, vector<8x8xf32> -> vector<8x8xf32>
    %cst_6 = arith.constant dense<0xFF800000> : vector<8xf32>
    %13 = vector.multi_reduction <maximumf>, %12, %cst_6 [1] : vector<8x8xf32> to vector<8xf32>
    %14 = vector.shape_cast %13 : vector<8xf32> to vector<8x1xf32>
    %15 = vector.broadcast %14 : vector<8x1xf32> to vector<8x8xf32>
    %16 = arith.subf %12, %15 : vector<8x8xf32>
    %17 = math.exp %16 : vector<8x8xf32>
    %cst_7 = arith.constant dense<0.000000e+00> : vector<8xf32>
    %18 = vector.multi_reduction <add>, %17, %cst_7 [1] : vector<8x8xf32> to vector<8xf32>
    %19 = vector.shape_cast %18 : vector<8xf32> to vector<8x1xf32>
    %20 = tpu.reciprocal %19 {approx = true} : vector<8x1xf32> -> vector<8x1xf32>
    %21 = vector.broadcast %20 : vector<8x1xf32> to vector<8x8xf32>
    %22 = arith.mulf %17, %21 : vector<8x8xf32>
    %cst_8 = arith.constant dense<0.000000e+00> : vector<8x32xf32>
    %23 = tpu.matmul %22, %11, %cst_8 {dimension_numbers = #tpu.dot_dimension_numbers<[1], [0], [0], [1], [0, 0, 1, 1], [], []>} : vector<8x8xf32>, vector<8x32xf32>, vector<8x32xf32> -> vector<8x32xf32>
    %24 = vector.extract_strided_slice %6 {offsets = [0, 32], sizes = [8, 32], strides = [1, 1]} : vector<8x128xf32> to vector<8x32xf32>
    %25 = vector.extract_strided_slice %7 {offsets = [0, 32], sizes = [8, 32], strides = [1, 1]} : vector<8x128xf32> to vector<8x32xf32>
    %26 = vector.extract_strided_slice %8 {offsets = [0, 32], sizes = [8, 32], strides = [1, 1]} : vector<8x128xf32> to vector<8x32xf32>
    %cst_9 = arith.constant dense<0.000000e+00> : vector<8x8xf32>
    %27 = tpu.matmul %24, %25, %cst_9 {dimension_numbers = #tpu.dot_dimension_numbers<[1], [1], [0], [0], [0, 0, 1, 0], [], []>} : vector<8x32xf32>, vector<8x32xf32>, vector<8x8xf32> -> vector<8x8xf32>
    %cst_10 = arith.constant dense<0xFF800000> : vector<8xf32>
    %28 = vector.multi_reduction <maximumf>, %27, %cst_10 [1] : vector<8x8xf32> to vector<8xf32>
    %29 = vector.shape_cast %28 : vector<8xf32> to vector<8x1xf32>
    %30 = vector.broadcast %29 : vector<8x1xf32> to vector<8x8xf32>
    %31 = arith.subf %27, %30 : vector<8x8xf32>
    %32 = math.exp %31 : vector<8x8xf32>
    %cst_11 = arith.constant dense<0.000000e+00> : vector<8xf32>
    %33 = vector.multi_reduction <add>, %32, %cst_11 [1] : vector<8x8xf32> to vector<8xf32>
    %34 = vector.shape_cast %33 : vector<8xf32> to vector<8x1xf32>
    %35 = tpu.reciprocal %34 {approx = true} : vector<8x1xf32> -> vector<8x1xf32>
    %36 = vector.broadcast %35 : vector<8x1xf32> to vector<8x8xf32>
    %37 = arith.mulf %32, %36 : vector<8x8xf32>
    %cst_12 = arith.constant dense<0.000000e+00> : vector<8x32xf32>
    %38 = tpu.matmul %37, %26, %cst_12 {dimension_numbers = #tpu.dot_dimension_numbers<[1], [0], [0], [1], [0, 0, 1, 1], [], []>} : vector<8x8xf32>, vector<8x32xf32>, vector<8x32xf32> -> vector<8x32xf32>
    %39 = vector.extract_strided_slice %6 {offsets = [0, 64], sizes = [8, 32], strides = [1, 1]} : vector<8x128xf32> to vector<8x32xf32>
    %40 = vector.extract_strided_slice %7 {offsets = [0, 64], sizes = [8, 32], strides = [1, 1]} : vector<8x128xf32> to vector<8x32xf32>
    %41 = vector.extract_strided_slice %8 {offsets = [0, 64], sizes = [8, 32], strides = [1, 1]} : vector<8x128xf32> to vector<8x32xf32>
    %cst_13 = arith.constant dense<0.000000e+00> : vector<8x8xf32>
    %42 = tpu.matmul %39, %40, %cst_13 {dimension_numbers = #tpu.dot_dimension_numbers<[1], [1], [0], [0], [0, 0, 1, 0], [], []>} : vector<8x32xf32>, vector<8x32xf32>, vector<8x8xf32> -> vector<8x8xf32>
    %cst_14 = arith.constant dense<0xFF800000> : vector<8xf32>
    %43 = vector.multi_reduction <maximumf>, %42, %cst_14 [1] : vector<8x8xf32> to vector<8xf32>
    %44 = vector.shape_cast %43 : vector<8xf32> to vector<8x1xf32>
    %45 = vector.broadcast %44 : vector<8x1xf32> to vector<8x8xf32>
    %46 = arith.subf %42, %45 : vector<8x8xf32>
    %47 = math.exp %46 : vector<8x8xf32>
    %cst_15 = arith.constant dense<0.000000e+00> : vector<8xf32>
    %48 = vector.multi_reduction <add>, %47, %cst_15 [1] : vector<8x8xf32> to vector<8xf32>
    %49 = vector.shape_cast %48 : vector<8xf32> to vector<8x1xf32>
    %50 = tpu.reciprocal %49 {approx = true} : vector<8x1xf32> -> vector<8x1xf32>
    %51 = vector.broadcast %50 : vector<8x1xf32> to vector<8x8xf32>
    %52 = arith.mulf %47, %51 : vector<8x8xf32>
    %cst_16 = arith.constant dense<0.000000e+00> : vector<8x32xf32>
    %53 = tpu.matmul %52, %41, %cst_16 {dimension_numbers = #tpu.dot_dimension_numbers<[1], [0], [0], [1], [0, 0, 1, 1], [], []>} : vector<8x8xf32>, vector<8x32xf32>, vector<8x32xf32> -> vector<8x32xf32>
    %54 = vector.extract_strided_slice %6 {offsets = [0, 96], sizes = [8, 32], strides = [1, 1]} : vector<8x128xf32> to vector<8x32xf32>
    %55 = vector.extract_strided_slice %7 {offsets = [0, 96], sizes = [8, 32], strides = [1, 1]} : vector<8x128xf32> to vector<8x32xf32>
    %56 = vector.extract_strided_slice %8 {offsets = [0, 96], sizes = [8, 32], strides = [1, 1]} : vector<8x128xf32> to vector<8x32xf32>
    %cst_17 = arith.constant dense<0.000000e+00> : vector<8x8xf32>
    %57 = tpu.matmul %54, %55, %cst_17 {dimension_numbers = #tpu.dot_dimension_numbers<[1], [1], [0], [0], [0, 0, 1, 0], [], []>} : vector<8x32xf32>, vector<8x32xf32>, vector<8x8xf32> -> vector<8x8xf32>
    %cst_18 = arith.constant dense<0xFF800000> : vector<8xf32>
    %58 = vector.multi_reduction <maximumf>, %57, %cst_18 [1] : vector<8x8xf32> to vector<8xf32>
    %59 = vector.shape_cast %58 : vector<8xf32> to vector<8x1xf32>
    %60 = vector.broadcast %59 : vector<8x1xf32> to vector<8x8xf32>
    %61 = arith.subf %57, %60 : vector<8x8xf32>
    %62 = math.exp %61 : vector<8x8xf32>
    %cst_19 = arith.constant dense<0.000000e+00> : vector<8xf32>
    %63 = vector.multi_reduction <add>, %62, %cst_19 [1] : vector<8x8xf32> to vector<8xf32>
    %64 = vector.shape_cast %63 : vector<8xf32> to vector<8x1xf32>
    %65 = tpu.reciprocal %64 {approx = true} : vector<8x1xf32> -> vector<8x1xf32>
    %66 = vector.broadcast %65 : vector<8x1xf32> to vector<8x8xf32>
    %67 = arith.mulf %62, %66 : vector<8x8xf32>
    %cst_20 = arith.constant dense<0.000000e+00> : vector<8x32xf32>
    %68 = tpu.matmul %67, %56, %cst_20 {dimension_numbers = #tpu.dot_dimension_numbers<[1], [0], [0], [1], [0, 0, 1, 1], [], []>} : vector<8x8xf32>, vector<8x32xf32>, vector<8x32xf32> -> vector<8x32xf32>
    %69 = tpu.concatenate %23, %38, %53, %68 in 1 : vector<8x32xf32>, vector<8x32xf32>, vector<8x32xf32>, vector<8x32xf32> -> vector<8x128xf32>
    %c0_21 = arith.constant 0 : index
    %c0_22 = arith.constant 0 : index
    %70 = vector.load %arg3[%c0_21, %c0_22] : memref<128x32xf32, #tpu.memory_space<vmem>>, vector<128x32xf32>
    %cst_23 = arith.constant dense<0.000000e+00> : vector<8x32xf32>
    %71 = tpu.matmul %69, %70, %cst_23 {dimension_numbers = #tpu.dot_dimension_numbers<[1], [0], [0], [1], [0, 0, 1, 1], [], []>} : vector<8x128xf32>, vector<128x32xf32>, vector<8x32xf32> -> vector<8x32xf32>
    %c0_24 = arith.constant 0 : index
    %c0_25 = arith.constant 0 : index
    %72 = vector.load %arg4[%c0_24, %c0_25] : memref<1x32xf32, #tpu.memory_space<vmem>>, vector<1x32xf32>
    %73 = vector.broadcast %72 : vector<1x32xf32> to vector<8x32xf32>
    %74 = arith.addf %71, %73 : vector<8x32xf32>
    %c0_26 = arith.constant 0 : index
    %c0_27 = arith.constant 0 : index
    %c0_28 = arith.constant 0 : index
    %75 = vector.load %arg5[%c0_26, %c0_27, %c0_28] : memref<1x8x32xf32, #tpu.memory_space<vmem>>, vector<1x8x32xf32>
    %76 = vector.shape_cast %75 : vector<1x8x32xf32> to vector<8x32xf32>
    %77 = vector.shape_cast %74 : vector<8x32xf32> to vector<1x8x32xf32>
    tpu.vector_store %arg5[%c0_26, %c0_27, %c0_28], %77 {strides = array<i32>} : memref<1x8x32xf32, #tpu.memory_space<vmem>>, vector<1x8x32xf32>,
    return
  }
  func.func @transform_0(%arg0: i32) -> (i32, i32, i32) {
    %c0_i32 = arith.constant 0 : i32
    %c0_i32_0 = arith.constant 0 : i32
    %c0_i32_1 = arith.constant 0 : i32
    return %arg0, %c0_i32, %c0_i32_0 : i32, i32, i32
  }
  func.func @transform_1(%arg0: i32) -> (i32, i32) {
    %c0_i32 = arith.constant 0 : i32
    %c0_i32_0 = arith.constant 0 : i32
    %c0_i32_1 = arith.constant 0 : i32
    return %c0_i32, %c0_i32_0 : i32, i32
  }
  func.func @transform_2(%arg0: i32) -> (i32, i32) {
    %c0_i32 = arith.constant 0 : i32
    %c0_i32_0 = arith.constant 0 : i32
    %c0_i32_1 = arith.constant 0 : i32
    return %c0_i32, %c0_i32_0 : i32, i32
  }
  func.func @transform_3(%arg0: i32) -> (i32, i32) {
    %c0_i32 = arith.constant 0 : i32
    %c0_i32_0 = arith.constant 0 : i32
    %c0_i32_1 = arith.constant 0 : i32
    return %c0_i32, %c0_i32_0 : i32, i32
  }
  func.func @transform_4(%arg0: i32) -> (i32, i32, i32) {
    %c0_i32 = arith.constant 0 : i32
    %c0_i32_0 = arith.constant 0 : i32
    %c0_i32_1 = arith.constant 0 : i32
    return %arg0, %c0_i32, %c0_i32_0 : i32, i32, i32
  }
}

</mosaic_0001>

<bundles_post_ra>
// kernel: tpu_custom_call.1
= control target key start
LH: loop header
LB: loop body
LE: loop exit
PB: predicated region body
PF: predicated region fallthrough
CT: control target
= control target key end

     0   :  { %9 = vsyncpa [#allocation3], 0  ;;  %s1769_s0 = inlined_call_operand.vmem [shape: f32[2,8,32], index: 0, kind: input, shape index: {}]   ;;  %s1770_s1 = inlined_call_operand.vmem [shape: f32[32,384], index: 1, kind: input, shape index: {}]   ;;  %s1771_s2 = inlined_call_operand.vmem [shape: f32[128,32], index: 2, kind: input, shape index: {}]   ;;  %s1772_s3 = inlined_call_operand.vmem [shape: f32[1,32], index: 3, kind: input, shape index: {}]   ;;  %s1773_s4 = inlined_call_operand.hbm [shape: f32[2,8,32], index: 4, kind: output, shape index: {}]  }
   0x1   :  { %11 = vsyncpa [#allocation3 + $0x1], 0  ;;  %s1495_s15 = smov 0   ;;  %s1497_s16 = smov 0  }
   0x2   :  { %s1499_s17 = smov 0   ;;  %s1501_s18 = smov 0  }
   0x3 LB: > { %s1516_s19 = sadd.s32 4294967295, %s1462_s18   ;;  %s1193_s20 = sadd.s32 4294967294, %s1462_s18   ;;  %s1462_s18 = sphi %s1501_s18, %s1779_s18   ;;  %s1458_s17 = sphi %s1499_s17, %s1778_s17   ;;  %s1454_s16 = sphi %s1497_s16, %s1777_s16   ;;  %s1450_s15 = sphi %s1495_s15, %s1776_s15  }
   0x4   : > { %s1520_s21 = sadd.s32 1, %s1462_s18   ;;  %s113_s22 = sadd.s32 1, %s1458_s17 }
   0x5   : > { %s110_s23 = ssub.s32 %s1462_s18, %s1520_s21  ;;  %p123_p0 = scmp.ne.s32.totalorder %s1458_s17, %s1454_s16 }
   0x6   : > { %p111_p1 = scmp.eq.s32.totalorder %s110_s23, 0  ;;  %p124_p2 = scmp.eq.s32.totalorder %s1516_s19, 1 }
   0x7   : > { %p129_p3 = scmp.ne.s32.totalorder %s1454_s16, %s1450_s15  ;;  %p130_p4 = scmp.eq.s32.totalorder %s1193_s20, 1 }
   0x8   : > { %s1531_s24 = scalar_select %p111_p1, %s1458_s17, %s113_s22  }
   0x9   : > { %p1533_p5 = por %p124_p2, %p123_p0  ;;  %p1537_p6 = por %p130_p4, %p129_p3 }
   0xa   : > { %p1196_p7 = scmp.ge.s32.totalorder %s1462_s18, 1  ;;  %p164_p8 = scmp.lt.s32.totalorder %s1462_s18, 3 }
   0xc   : > { %p165_p9 = pnand %p1196_p7, %p164_p8 }
   0xd   : > { %p189_p10 = scmp.lt.s32.totalorder (!%p165_p9), %s1516_s19, 1  ;;  %s1466_s13 = smov (!%p165_p9), 96  }
   0xe   : > { %168 = sbr.rel (%p165_p9) target bundleno = 1822 (0x71e), region = 36  ;;  %s1467_s14 = smov (!%p165_p9), 64  }
   0xf   : > { %s1468_s20 = smov (!%p165_p9), 32  }
  0x13   : > { %v204_v0 = vld [vmem:[%s1770_s1 + $0x50] sm:$0xff]  ;;  %v203_v1 = vld [vmem:[%s1770_s1 + $0x48] sm:$0xff]  ;;  %v201_v2 = vld [vmem:[%s1770_s1 + $0x38] sm:$0xff]  ;;  %v1464_v4 = vmov 0.0   ;;  %s190_s11 = scalar_select %p189_p10, %s1516_s19, 1  ;;  %vm206_vm0 = vcmask 261120  }
  0x14   : > { %234 = vmatprep.subr.mxu1 %v204_v0  ;;  %v200_v3 = vld [vmem:[%s1770_s1 + $0x30] sm:$0xff]  ;;  %274 = vmatprep.mubr.f32.mxu1 %v1464_v4  ;;  %v198_v5 = vld [vmem:[%s1770_s1 + $0x20] sm:$0xff]  ;;  %v197_v6 = vld [vmem:[%s1770_s1 + $0x18] sm:$0xff]  ;;  %vm1465_vm1 = vmmov 0   ;;  %vm428_vm2 = vcmask 64512   ;;  %vm1022_vm3 = vcmask 523264  }
  0x15   : > { %235 = vmatpush1.msra.mxu1 %v203_v1  ;;  %1287 = vmatprep.subr.mxu0 %v1464_v4  ;;  %v195_v7 = vld [vmem:[%s1770_s1 + $0x8] sm:$0xff]  ;;  %s1198_s22 = sshll.u32 %s190_s11, 3  ;;  %v194_v8 = vld [vmem:[%s1770_s1] sm:$0xff]  ;;  %v205_v10 = vld [vmem:[%s1770_s1 + $0x58] sm:$0xff]  ;;  %vm1024_vm4 = vcmask 785408  }
  0x16   : > { %236 = vmatprep.subr.mxu1 %v201_v2  ;;  %s192_s30 = scalar_lea.vmem %s1769_s0, %s1198_s22  ;;  %v202_v11 = vld [vmem:[%s1770_s1 + $0x40] sm:$0xff]  ;;  %v199_v12 = vld [vmem:[%s1770_s1 + $0x28] sm:$0xff]  ;;  %v196_v13 = vld [vmem:[%s1770_s1 + $0x10] sm:$0xff]  ;;  %1289 = vmatprep.mubr.msk.f32.mxu0 %vm1465_vm1, %v1464_v4 }
  0x17   : > { %237 = vmatpush1.msra.mxu1 %v200_v3  ;;  %v193_v9 = vld [vmem:[%s192_s30] sm:$0xff] }
  0x18   : > { %238 = vmatprep.subr.mxu1 %v198_v5 }
  0x19   : > { %239 = vmatpush1.msra.mxu1 %v197_v6 }
  0x1a   : > { %240 = vmatprep.subr.mxu1 %v195_v7 }
  0x1b   : > { %241 = vmatpush1.msra.mxu1 %v194_v8 }
  0x1c   : > { %1199 = vmatmul.mubr.msk.f32.vlgmr.msra.gmra.mxu1 %vm206_vm0, %v193_v9  ;;  %1256 = vmatprep.subr.mxu1 %v1464_v4 }
  0x1d   : > { %1257 = vmatpush3.msra.mxu1 %v205_v10  ;;  %1264 = vmatprep.mubr.msk.f32.mxu1 %vm1465_vm1, %v1464_v4 }
  0x1e   : > { %1258 = vmatprep.subr.mxu1 %v1464_v4 }
  0x1f   : > { %1259 = vmatpush3.msra.mxu1 %v202_v11  ;;  %v1041_v11 = vld [vmem:[%s1771_s2 + $0x78] sm:$0xff] }
  0x20   : > { %1260 = vmatprep.subr.mxu1 %v1464_v4 }
  0x21   : > { %1261 = vmatpush3.msra.mxu1 %v199_v12  ;;  %v1040_v12 = vld [vmem:[%s1771_s2 + $0x70] sm:$0xff] }
  0x22   : > { %1262 = vmatprep.subr.mxu1 %v1464_v4 }
  0x23   : > { %1263 = vmatpush3.msra.mxu1 %v196_v13  ;;  %v1039_v13 = vld [vmem:[%s1771_s2 + $0x68] sm:$0xff] }
  0x24   : > { %1265 = vmatmul.mubr.msk.f32.vlgmr.msra.gmra.mxu1 %vm206_vm0, %v193_v9  ;;  %1267 = vmatprep.subr.mxu1 %v1464_v4 }
  0x25   : > { %1269 = vmatprep.mubr.msk.f32.mxu1 %vm1465_vm1, %v1464_v4 }
  0xdc   : > { %v276_v14 = vpop.f32.mrf.mxu1 }
  0xdd   : > { %v351_v16 = vmul.f32 0.17677669, %v276_v14  ;;  %v1038_v14 = vld [vmem:[%s1771_s2 + $0x60] sm:$0xff] }
  0xde   : > { %v278_v15 = vpop.f32.mrf.mxu1 }
  0xdf   : > { %515 = vrot.lane.b32.xlu1 %v278_v15, %s1466_s13  ;;  %1268 = vmatpush3.xpose.msk.msra.mxu1 %vm206_vm0, %v278_v15 }
  0xe0   : > { %1272 = vmatprep.subr.mxu1 %v1464_v4 }
  0xe2   : > { %1270 = vmatmul.mubr.msk.f32.vlgmr.msra.gmra.mxu1 %vm206_vm0, %v351_v16 }
  0xe3   : > { %513 = vrot.lane.b32.xlu1 %v351_v16, %s1466_s13  ;;  %1274 = vmatprep.mubr.msk.f32.mxu1 %vm1465_vm1, %v1464_v4 }
  0xe4   : > { %v1609_v17 = vpop.f32.mrf.mxu1 }
  0xe5   : > { %1273 = vmatpush3.msra.mxu1 %v1609_v17 }
  0xe6   : > { %v1266_v18 = vpop.f32.mrf.mxu1  ;;  %1277 = vmatprep.subr.mxu1 %v1464_v4 }
  0xe7   : > { %679 = vrot.lane.b32.xlu1 %v351_v16, %s1467_s14  ;;  %v1034_v18 = vld [vmem:[%s1771_s2 + $0x40] sm:$0xff] }
  0xeb   : > { %846 = vrot.lane.b32.xlu1 %v278_v15, %s1468_s20 }
  0xef   : > { %844 = vrot.lane.b32.xlu1 %v351_v16, %s1468_s20  ;;  %v1036_v16 = vld [vmem:[%s1771_s2 + $0x50] sm:$0xff] }
 0x151   : > { %v516_v27 = vpop.permute.xlu1 %515 }
 0x155   : > { %v514_v28 = vpop.permute.xlu1 %513 }
 0x159   : > { %v680_v29 = vpop.permute.xlu1 %679 }
 0x15d   : > { %v847_v32 = vpop.permute.xlu1 %846 }
 0x161   : > { %v845_v33 = vpop.permute.xlu1 %844 }
 0x1a2   : > { %v424_v19 = vpop.f32.mrf.mxu1 }
 0x1a3   : > { %v429_v20 = vsel %vm428_vm2, %v424_v19, -inf }
 0x1a4   : > { %430 = vmax.xlane.f32.xlu0 %v429_v20  ;;  %v1271_v21 = vpop.f32.mrf.mxu1  ;;  %v1032_v20 = vld [vmem:[%s1771_s2 + $0x30] sm:$0xff] }
 0x1a5   : > { %v1031_v21 = vld [vmem:[%s1771_s2 + $0x28] sm:$0xff] }
 0x22d   : > { %v431_v22 = vpop.xlane.xlu0 %430 }
 0x22e   : > { %v432_v23 = vsub.f32 %v424_v19, %v431_v22  ;;  %v1033_v19 = vld [vmem:[%s1771_s2 + $0x38] sm:$0xff]  ;;  %v1030_v22 = vld [vmem:[%s1771_s2 + $0x20] sm:$0xff] }
 0x230   : > { %v433_v24 = vmul.f32 1.442695, %v432_v23  ;;  %v1029_v23 = vld [vmem:[%s1771_s2 + $0x18] sm:$0xff] }
 0x232   : > { %1386 = vpow2.f32 %v433_v24  ;;  %v1028_v24 = vld [vmem:[%s1771_s2 + $0x10] sm:$0xff] }
 0x23f   : > { %v1387_v25 = vpop.eup %1386 }
 0x240   : > { %v435_v26 = vsel %vm428_vm2, %v1387_v25, 0.0 }
 0x241   : > { %436 = vadd.xlane.f32.xlu0 %v435_v26  ;;  %v1026_v26 = vld [vmem:[%s1771_s2] sm:$0xff] }
 0x257   : > { %681 = vrot.lane.b32.xlu0 %v278_v15, %s1467_s14  ;;  %v1037_v15 = vld [vmem:[%s1771_s2 + $0x58] sm:$0xff] }
 0x2ca   : > { %v437_v30 = vpop.xlane.xlu0 %436 }
 0x2cb   : > { %1388 = vrcp.f32 %v437_v30 }
 0x2ce   : > { %v682_v31 = vpop.permute.xlu0 %681 }
 0x2cf   : > { %1288 = vmatpush3.xpose.msk.msra.mxu0 %vm206_vm0, %v682_v31 }
 0x2d0   : > { %1297 = vmatprep.subr.mxu0 %v1464_v4 }
 0x2d2   : > { %1290 = vmatmul.mubr.msk.f32.vlgmr.msra.gmra.mxu0 %vm206_vm0, %v680_v29 }
 0x2d3   : > { %1298 = vmatpush3.xpose.msk.msra.mxu0 %vm206_vm0, %v847_v32  ;;  %1299 = vmatprep.mubr.msk.f32.mxu0 %vm1465_vm1, %v1464_v4 }
 0x2d4   : > { %1307 = vmatprep.subr.mxu0 %v1464_v4 }
 0x2d6   : > { %1300 = vmatmul.mubr.msk.f32.vlgmr.msra.gmra.mxu0 %vm206_vm0, %v845_v33 }
 0x2d7   : > { %1339 = vmatprep.mubr.msk.f32.mxu0 %vm1465_vm1, %v1464_v4  ;;  %1308 = vmatpush3.msra.mxu0 %v1041_v11 }
 0x2d8   : > { %v1389_v34 = vpop.eup %1388  ;;  %1309 = vmatprep.subr.mxu0 %v1464_v4 }
 0x2d9   : > { %v439_v35 = vmul.f32 %v1389_v34, %v1387_v25  ;;  %1310 = vmatpush3.msra.mxu0 %v1040_v12  ;;  %v1027_v25 = vld [vmem:[%s1771_s2 + $0x8] sm:$0xff] }
 0x2da   : > { %1311 = vmatprep.subr.mxu0 %v1464_v4 }
 0x2db   : > { %1275 = vmatmul.mubr.msk.f32.vlgmr.msra.gmra.mxu1 %vm428_vm2, %v439_v35  ;;  %1312 = vmatpush3.msra.mxu0 %v1039_v13 }
 0x2dc   : > { %1278 = vmatpush3.xpose.msk.msra.mxu1 %vm206_vm0, %v516_v27  ;;  %1279 = vmatprep.mubr.msk.f32.mxu1 %vm1465_vm1, %v1464_v4 }
 0x2dd   : > { %1282 = vmatprep.subr.mxu1 %v1464_v4  ;;  %1313 = vmatprep.subr.mxu0 %v1464_v4 }
 0x2de   : > { %1314 = vmatpush3.msra.mxu0 %v1038_v14 }
 0x2df   : > { %1280 = vmatmul.mubr.msk.f32.vlgmr.msra.gmra.mxu1 %vm206_vm0, %v514_v28  ;;  %1315 = vmatprep.subr.mxu0 %v1464_v4 }
 0x2e0   : > { %1284 = vmatprep.mubr.msk.f32.mxu1 %vm1465_vm1, %v1464_v4  ;;  %1316 = vmatpush3.msra.mxu0 %v1037_v15 }
 0x2e1   : > { %1317 = vmatprep.subr.mxu0 %v1464_v4 }
 0x2e2   : > { %1318 = vmatpush3.msra.mxu0 %v1036_v16 }
 0x2e3   : > { %1319 = vmatprep.subr.mxu0 %v1464_v4 }
 0x392   : > { %v753_v36 = vpop.f32.mrf.mxu0 }
 0x393   : > { %v757_v37 = vsel %vm428_vm2, %v753_v36, -inf }
 0x394   : > { %758 = vmax.xlane.f32.xlu0 %v757_v37  ;;  %v1291_v38 = vpop.f32.mrf.mxu0 }
 0x395   : > { %v1213_v38 = vld [vmem:[%s1772_s3] ss:$0 sm:$0xff] }
 0x396   : > { %v918_v39 = vpop.f32.mrf.mxu0 }
 0x397   : > { %v922_v46 = vsel %vm428_vm2, %v918_v39, -inf }
 0x398   : > { %v1301_v40 = vpop.f32.mrf.mxu0 }
 0x39b   : > { %v1635_v41 = vpop.f32.mrf.mxu1 }
 0x39d   : > { %v1276_v42 = vpop.f32.mrf.mxu1 }
 0x39f   : > { %v587_v43 = vpop.f32.mrf.mxu1 }
 0x3a0   : > { %v591_v44 = vsel %vm428_vm2, %v587_v43, -inf }
 0x3a1   : > { %592 = vmax.xlane.f32.xlu1 %v591_v44  ;;  %v1281_v45 = vpop.f32.mrf.mxu1 }
 0x3a5   : > { %923 = vmax.xlane.f32.xlu1 %v922_v46 }
 0x41d   : > { %v759_v47 = vpop.xlane.xlu0 %758 }
 0x41e   : > { %v760_v48 = vsub.f32 %v753_v36, %v759_v47 }
 0x420   : > { %v761_v49 = vmul.f32 1.442695, %v760_v48 }
 0x422   : > { %1390 = vpow2.f32 %v761_v49 }
 0x42a   : > { %v593_v50 = vpop.xlane.xlu1 %592 }
 0x42b   : > { %v594_v58 = vsub.f32 %v587_v43, %v593_v50 }
 0x42d   : > { %v595_v59 = vmul.f32 1.442695, %v594_v58 }
 0x42e   : > { %v924_v51 = vpop.xlane.xlu1 %923 }
 0x42f   : > { %v1391_v52 = vpop.eup %1390  ;;  %v925_v53 = vsub.f32 %v918_v39, %v924_v51 }
 0x430   : > { %v763_v54 = vsel %vm428_vm2, %v1391_v52, 0.0 }
 0x431   : > { %v926_v55 = vmul.f32 1.442695, %v925_v53  ;;  %764 = vadd.xlane.f32.xlu0 %v763_v54 }
 0x433   : > { %1392 = vpow2.f32 %v926_v55 }
 0x434   : > { %1394 = vpow2.f32 %v595_v59 }
 0x440   : > { %v1393_v56 = vpop.eup %1392 }
 0x441   : > { %v928_v57 = vsel %vm428_vm2, %v1393_v56, 0.0  ;;  %v1395_v60 = vpop.eup %1394 }
 0x442   : > { %929 = vadd.xlane.f32.xlu1 %v928_v57  ;;  %v597_v61 = vsel %vm428_vm2, %v1395_v60, 0.0 }
 0x447   : > { %603 = vrot.lane.b32.xlu0 %v1609_v17, %s1466_s13 }
 0x453   : > { %768 = vrot.lane.b32.xlu1 %v1609_v17, %s1467_s14 }
 0x477   : > { %598 = vadd.xlane.f32.xlu1 %v597_v61 }
 0x488   : > { %933 = vrot.lane.b32.xlu1 %v1609_v17, %s1468_s20  ;;  %v1035_v17 = vld [vmem:[%s1771_s2 + $0x48] sm:$0xff] }
 0x489   : > { %1320 = vmatpush3.msra.mxu0 %v1035_v17 }
 0x48a   : > { %1321 = vmatprep.subr.mxu0 %v1464_v4 }
 0x48b   : > { %1322 = vmatpush3.msra.mxu0 %v1034_v18 }
 0x48c   : > { %1323 = vmatprep.subr.mxu0 %v1464_v4 }
 0x48d   : > { %1324 = vmatpush3.msra.mxu0 %v1033_v19 }
 0x48e   : > { %1325 = vmatprep.subr.mxu0 %v1464_v4 }
 0x48f   : > { %1326 = vmatpush3.msra.mxu0 %v1032_v20 }
 0x490   : > { %1327 = vmatprep.subr.mxu0 %v1464_v4 }
 0x491   : > { %1328 = vmatpush3.msra.mxu0 %v1031_v21 }
 0x492   : > { %1329 = vmatprep.subr.mxu0 %v1464_v4 }
 0x493   : > { %1330 = vmatpush3.msra.mxu0 %v1030_v22 }
 0x494   : > { %1331 = vmatprep.subr.mxu0 %v1464_v4 }
 0x495   : > { %1332 = vmatpush3.msra.mxu0 %v1029_v23 }
 0x496   : > { %1333 = vmatprep.subr.mxu0 %v1464_v4 }
 0x497   : > { %1334 = vmatpush3.msra.mxu0 %v1028_v24 }
 0x498   : > { %1335 = vmatprep.subr.mxu0 %v1464_v4 }
 0x499   : > { %1336 = vmatpush3.msra.mxu0 %v1027_v25 }
 0x49a   : > { %1337 = vmatprep.subr.mxu0 %v1464_v4 }
 0x49b   : > { %1338 = vmatpush3.msra.mxu0 %v1026_v26 }
 0x4ba   : > { %v765_v62 = vpop.xlane.xlu0 %764 }
 0x4be   : > { %v604_v63 = vpop.permute.xlu0 %603 }
 0x4bf   : > { %1283 = vmatpush3.msra.mxu1 %v604_v63 }
 0x4c0   : > { %1292 = vmatprep.subr.mxu1 %v1464_v4 }
 0x4cb   : > { %v930_v0 = vpop.xlane.xlu1 %929 }
 0x4cf   : > { %v769_v1 = vpop.permute.xlu1 %768 }
 0x500   : > { %v599_v2 = vpop.xlane.xlu1 %598 }
 0x501   : > { %1396 = vrcp.f32 %v599_v2 }
 0x502   : > { %1398 = vrcp.f32 %v765_v62 }
 0x503   : > { %1400 = vrcp.f32 %v930_v0 }
 0x504   : > { %v934_v9 = vpop.permute.xlu1 %933 }
 0x50e   : > { %v1397_v3 = vpop.eup %1396 }
 0x50f   : > { %v601_v5 = vmul.f32 %v1397_v3, %v1395_v60  ;;  %v1399_v6 = vpop.eup %1398 }
 0x510   : > { %v767_v7 = vmul.f32 %v1399_v6, %v1391_v52  ;;  %v1401_v8 = vpop.eup %1400 }
 0x511   : > { %1285 = vmatmul.mubr.msk.f32.vlgmr.msra.gmra.mxu1 %vm428_vm2, %v601_v5  ;;  %v932_v10 = vmul.f32 %v1401_v8, %v1393_v56 }
 0x512   : > { %1293 = vmatpush3.msra.mxu1 %v769_v1  ;;  %1294 = vmatprep.mubr.msk.f32.mxu1 %vm1465_vm1, %v1464_v4 }
 0x513   : > { %1302 = vmatprep.subr.mxu1 %v1464_v4 }
 0x515   : > { %1295 = vmatmul.mubr.msk.f32.vlgmr.msra.gmra.mxu1 %vm428_vm2, %v767_v7 }
 0x516   : > { %1303 = vmatpush3.msra.mxu1 %v934_v9  ;;  %1304 = vmatprep.mubr.msk.f32.mxu1 %vm1465_vm1, %v1464_v4 }
 0x519   : > { %1305 = vmatmul.mubr.msk.f32.vlgmr.msra.gmra.mxu1 %vm428_vm2, %v932_v10 }
 0x5d1   : > { %v675_v27 = vpop.f32.mrf.mxu1 }
 0x5d2   : > { %1010 = vrot.lane.b32.xlu0 %v675_v27, %s1468_s20  ;;  %s186_s20 = sand.u32 1, %s1454_s16  }
 0x5d3   : > { %v1286_v28 = vpop.f32.mrf.mxu1  ;;  %s1121_s10 = scalar_lea.sflag [#allocation3], %s186_s20 }
 0x5d5   : > { %v840_v29 = vpop.f32.mrf.mxu1 }
 0x5d6   : > { %1014 = vrot.lane.b32.xlu1 %v840_v29, %s1467_s14  ;;  %s1197_s14 = sshll.u32 %s186_s20, 3 }
 0x5d7   : > { %v1296_v30 = vpop.f32.mrf.mxu1  ;;  %s188_s5 = scalar_lea.vmem [#allocation2], %s1197_s14 }
 0x5d8   : > { %s1134_s6 = sshll.u32 %s188_s5, 4  ;;  %s1135_s6 = int_to_ptr.vmem [resolvable:$true] %s1134_s6 }
 0x5d9   : > { %v1005_v31 = vpop.f32.mrf.mxu1  ;;  %s1402_s11 = scalar_lea.vmem %s1135_s6, 128 }
 0x5da   : > { %1018 = vrot.lane.b32.xlu0 %v1005_v31, %s1466_s13  ;;  %s1215_s13 = sshll.u32 %s1516_s19, 7  ;;  %p1403_p11 = scmp.ne.s32.totalorder %s1135_s6, %s1402_s11 }
 0x5db   : > { %v1306_v32 = vpop.f32.mrf.mxu1  ;;  %s1733_s9 = scalar_lea.hbm %s1773_s4, %s1215_s13  ;;  %s1469_s19 = smov [#allocation2]  }
 0x5dc   : > { %p1404_p12 = pnand %p1403_p11, %p1533_p5  ;;  %s1406_s12 = sshll.u32 %s1469_s19, 4  ;;  %s1407_s12 = int_to_ptr.vmem [resolvable:$false] %s1406_s12 }
 0x5dd   : > { %s1408_s22 = scalar_lea.vmem %s1407_s12, 256  ;;  %p1409_p0 = scmp.lt.s32.totalorder %s1135_s6, %s1407_s12 }
 0x5de   : > { %p1405_p13 = pneg %p1404_p12  ;;  %p1410_p1 = scmp.lt.s32.totalorder %s1408_s22, %s1402_s11 }
 0x5e0   : > { %p1411_p2 = por %p1410_p1, %p1409_p0 }
 0x5e2   : > { %p1412_p3 = pnand %p1411_p2, %p1405_p13 }
 0x644   : > { %v1011_v4 = vpop.permute.xlu0 %1010 }
 0x645   : > { %v1021_v34 = vsel %vm206_vm0, %v1635_v41, %v1011_v4 }
 0x648   : > { %v1015_v33 = vpop.permute.xlu1 %1014 }
 0x649   : > { %v1023_v35 = vsel %vm1022_vm3, %v1021_v34, %v1015_v33 }
 0x64c   : > { %v1019_v36 = vpop.permute.xlu0 %1018 }
 0x64d   : > { %v1025_v37 = vsel %vm1024_vm4, %v1023_v35, %v1019_v36 }
 0x64e   : > { %1340 = vmatmul.mubr.f32.vlgmr.msra.gmra.mxu0 %v1025_v37 }
 0x70e   : > { %v1115_v39 = vpop.f32.mrf.mxu0 }
 0x70f   : > { %v1116_v40 = vadd.f32 %v1213_v38, %v1115_v39 }
 0x710   : > { %v1341_v41 = vpop.f32.mrf.mxu0 }
 0x711   : > { %1119 = vst.msk [vmem:[%s188_s5] sm:$0xff] %vm206_vm0, %v1116_v40 }
 0x712   : > { %1415 = shalt.err (!%p1412_p3)
}
 0x713   : > { %s1416_s23 = scalar_lea.hbm %s1733_s9, 128  ;;  %s1420_s20 = scalar_lea.hbm %s1773_s4, 256 }
 0x714   : > { %p1417_p4 = scmp.ne.s32.totalorder %s1733_s9, %s1416_s23  ;;  %p1421_p9 = scmp.lt.s32.totalorder %s1733_s9, %s1773_s4 }
 0x715   : > { %p1422_p10 = scmp.lt.s32.totalorder %s1420_s20, %s1416_s23 }
 0x716   : > { %p1418_p7 = pnand %p1417_p4, %p1533_p5 }
 0x717   : > { %p1423_p11 = por %p1422_p10, %p1421_p9 }
 0x718   : > { %p1419_p8 = pneg %p1418_p7 }
 0x71a   : > { %p1424_p12 = pnand %p1423_p11, %p1419_p8 }
 0x71c   : > { %1427 = shalt.err (!%p1424_p12)
}
 0x71d   : > { %1342 = dma.vmem_to_hbm [thread:$0]  (%p1533_p5), %s1135_s6, 128, %s1733_s9, %s1121_s10  }
 0x71e PF: > { %p1348_p13 = scmp.ge.s32.totalorder %s1462_s18, 2  ;;  %s1146_s30 = sand.u32 1, %s1450_s15  }
 0x71f   : > { %s1147_s13 = scalar_lea.sflag [#allocation3], %s1146_s30 }
 0x720   : > { %p1345_p0 = pnand %p1348_p13, %p1537_p6 }
 0x722   : > { %p1346_p1 = pneg %p1345_p0 }
 0x724   : > { %1445 = dma.done.wait (%p1346_p1), %s1147_s13, 128  }
 0x725   : > { %1447 = vsyncadd (%p1346_p1), %s1147_s13, 4294967168  ;;  %p14_p2 = scmp.ge.s32.totalorder %s1520_s21, 4   ;;  %s1776_s15 = smov %s1454_s16 }
 0x726   : > { %s1777_s16 = smov %s1458_s17  ;;  %s1778_s17 = smov %s1531_s24 }
 0x727   : > { %s1779_s18 = smov %s1520_s21  ;;  %16 = sbr.rel (!%p14_p2) target bundleno = 3 (0x3), region = 71 }
 0x72c   :  { %1152 = vsyncpa [#allocation3], 1 }
 0x72d   :  { %1154 = vsyncpa [#allocation3 + $0x1], 1 }

</bundles_post_ra>
